<compile_context>
chip_gen: v6e
topology: v6e:2x2x1
jax: 0.10.0
libtpu: 0.0.40
codegen_flags: <defaults>
</compile_context>

<pallas_src>
import functools

import jax
import jax.numpy as jnp
from jax.experimental import pallas as pl
from jax.experimental.pallas import tpu as pltpu


# ---------------------------------------------------------------------------
# Kernel
# ---------------------------------------------------------------------------
def dueling_dqn_kernel(x_ref, trunk_ref, h1w_ref, h2w_ref, bias_ref, out_ref,
                       *, num_actions, num_valid_rows):
    f32 = jnp.float32
    bf16 = jnp.bfloat16

    # Packed parameters (single loads, then cheap static value slices).
    tw = trunk_ref[...]          # (144, 64)  bf16: [W1p(16); W2p(64); W3(64)]
    bv = bias_ref[...]           # (8, 1024)  f32 : rows 0..4 hold the biases

    w1 = tw[0:16, :]             # (16, 64)   cols 32:64 are zero padding
    w2 = tw[16:80, :]            # (64, 64)   rows 48:80 are zero padding
    w3 = tw[80:144, :]           # (64, 64)   (all offsets multiples of 16)

    b1 = bv[0:1, 0:64]           # padded with zeros beyond col 32
    b2 = bv[1:2, 0:64]
    b3 = bv[2:3, 0:64]
    bh1 = bv[3:4, :]             # (1, 1024) = [ba1 | bv1]
    bh2 = bv[4:5, 0:128]         # (1, 128)  = [ba2 | bv2 | 0...]  lane-dense

    # Shared trunk: three Linear + ReLU layers (bf16 MXU inputs, f32 accum,
    # f32 elementwise).
    x = x_ref[...].astype(bf16)
    h = jnp.maximum(jnp.dot(x, w1, preferred_element_type=f32) + b1, 0.0)
    h = jnp.maximum(jnp.dot(h.astype(bf16), w2, preferred_element_type=f32) + b2, 0.0)
    h = jnp.maximum(jnp.dot(h.astype(bf16), w3, preferred_element_type=f32) + b3, 0.0)
    # x.view(B, -1) is a no-op: trunk output is already (B, 64), padded lanes = 0.

    # Fused heads, stage 1: [adv1 | val1] in one (64, 1024) matmul.
    y1 = jnp.maximum(
        jnp.dot(h.astype(bf16), h1w_ref[...], preferred_element_type=f32) + bh1,
        0.0)

    # Fused heads, stage 2: block-diagonal [adv2 ; val2], padded to 128 lanes.
    # Lanes 0..NA-1 = adv, lane NA = val, lanes NA+1..127 = zeros from padding.
    y2 = jnp.dot(y1.astype(bf16), h2w_ref[...], preferred_element_type=f32) + bh2

    rows, lanes = y2.shape
    lane_idx = jax.lax.broadcasted_iota(jnp.int32, (rows, lanes), 1)
    row_idx = jax.lax.broadcasted_iota(jnp.int32, (rows, lanes), 0)

    # Global adv.mean() over REAL rows and the first num_actions lanes only
    # (exactly PyTorch's adv.mean(); batch-pad rows are masked out).
    adv_mask = (lane_idx < num_actions) & (row_idx < num_valid_rows)
    adv_sum = jnp.sum(jnp.where(adv_mask, y2, 0.0))
    adv_mean = adv_sum * (1.0 / float(num_actions * num_valid_rows))

    # val column (lane == num_actions) broadcast across lanes via masked reduce.
    val_col = jnp.sum(jnp.where(lane_idx == num_actions, y2, 0.0),
                      axis=-1, keepdims=True)

    # PyTorch: val + adv - adv.mean().  Computed full-width (padded lanes hold
    # don't-care values); the wrapper slices back to [:batch, :num_actions].
    out_ref[...] = y2 + val_col - adv_mean


# ---------------------------------------------------------------------------
# Wrapper
# ---------------------------------------------------------------------------
def dueling_dqn_forward(x, packed, num_actions):
    batch, _ = x.shape
    assert num_actions + 1 <= 128, "packing assumes num_actions + 1 <= 128"

    # Sublane-pad the batch to a multiple of 8 (>= 8) so the output store is a
    # full, unmasked (8k, 128) tile.  Padded rows are excluded from adv.mean()
    # inside the kernel and sliced off below.
    b_pad = max(8, ((batch + 7) // 8) * 8)
    if b_pad != batch:
        x = jnp.pad(x, ((0, b_pad - batch), (0, 0)))

    vmem = pl.BlockSpec(memory_space=pltpu.MemorySpace.VMEM)

    flops_per_row = 2 * (16 * 64 + 64 * 64 + 64 * 64 + 64 * 1024 + 1024 * 128)
    bytes_accessed = (x.size * 4
                      + packed["trunk_w"].size * 2
                      + packed["head1_w"].size * 2
                      + packed["head2_w"].size * 2
                      + packed["biases"].size * 4
                      + b_pad * 128 * 4)
    cost = pl.CostEstimate(flops=b_pad * flops_per_row,
                           transcendentals=0,
                           bytes_accessed=bytes_accessed)

    out_padded = pl.pallas_call(
        functools.partial(dueling_dqn_kernel,
                          num_actions=num_actions,
                          num_valid_rows=batch),
        out_shape=jax.ShapeDtypeStruct((b_pad, 128), jnp.float32),
        in_specs=[vmem] * 5,
        out_specs=vmem,
        cost_estimate=cost,
    )(x, packed["trunk_w"], packed["head1_w"], packed["head2_w"],
      packed["biases"])
    return out_padded[:batch, :num_actions]


# ---------------------------------------------------------------------------
# Parameter init (PyTorch-style) and host-side packing
# ---------------------------------------------------------------------------
def init_params(key, in_features, num_actions):
    """Deterministic init mimicking PyTorch nn.Linear default U[-1/sqrt(fan_in), +]."""
    feature_size = 64  # mlp3 output dim for a (1, in_features) input

    def linear(key, fan_in, fan_out):
        kw, kb = jax.random.split(key)
        bound = 1.0 / (fan_in ** 0.5)
        w = jax.random.uniform(kw, (fan_in, fan_out), jnp.float32, -bound, bound)
        b = jax.random.uniform(kb, (1, fan_out), jnp.float32, -bound, bound)
        return w, b

    keys = jax.random.split(key, 7)
    p = {}
    p["w1"], p["b1"] = linear(keys[0], in_features, 32)
    p["w2"], p["b2"] = linear(keys[1], 32, 64)
    p["w3"], p["b3"] = linear(keys[2], 64, 64)
    p["wa1"], p["ba1"] = linear(keys[3], feature_size, 512)
    p["wa2"], p["ba2"] = linear(keys[4], 512, num_actions)
    p["wv1"], p["bv1"] = linear(keys[5], feature_size, 512)
    p["wv2"], p["bv2"] = linear(keys[6], 512, 1)
    return p


def pack_params(p, num_actions):
    """Pack 14 tensors into 3 bf16 weight buffers + 1 f32 bias buffer (once)."""
    bf16 = jnp.bfloat16
    na = num_actions
    assert na + 1 <= 128, "packing assumes num_actions + 1 <= 128"

    # Trunk: pad layer widths to 64 so all three stack into one (144, 64)
    # buffer; slice starts (0 / 16 / 80) are multiples of 16 for bf16 sublanes.
    trunk_w = jnp.zeros((144, 64), bf16)
    trunk_w = trunk_w.at[0:16, 0:32].set(p["w1"].astype(bf16))     # (16, 32)
    trunk_w = trunk_w.at[16:48, 0:64].set(p["w2"].astype(bf16))    # (32, 64)
    trunk_w = trunk_w.at[80:144, 0:64].set(p["w3"].astype(bf16))   # (64, 64)

    # Head stage 1: [adv1 | val1] -> (64, 1024).
    head1_w = jnp.concatenate([p["wa1"], p["wv1"]], axis=1).astype(bf16)

    # Head stage 2: block-diagonal [adv2 ; val2], lane-padded to (1024, 128).
    head2_w = jnp.zeros((1024, 128), bf16)
    head2_w = head2_w.at[0:512, 0:na].set(p["wa2"].astype(bf16))
    head2_w = head2_w.at[512:1024, na:na + 1].set(p["wv2"].astype(bf16))

    # Biases: one (8, 1024) f32 buffer (rows 5..7 are padding).
    biases = jnp.zeros((8, 1024), jnp.float32)
    biases = biases.at[0:1, 0:32].set(p["b1"])
    biases = biases.at[1:2, 0:64].set(p["b2"])
    biases = biases.at[2:3, 0:64].set(p["b3"])
    biases = biases.at[3:4, 0:512].set(p["ba1"])
    biases = biases.at[3:4, 512:1024].set(p["bv1"])
    biases = biases.at[4:5, 0:na].set(p["ba2"])
    biases = biases.at[4:5, na:na + 1].set(p["bv2"])

    return {"trunk_w": trunk_w, "head1_w": head1_w, "head2_w": head2_w,
            "biases": biases}


# ---------------------------------------------------------------------------
# References
# ---------------------------------------------------------------------------
def reference_forward_f32(x, p):
    """Pure-JAX f32 reference matching the PyTorch forward (unpacked params)."""
    h = jax.nn.relu(x @ p["w1"] + p["b1"])
    h = jax.nn.relu(h @ p["w2"] + p["b2"])
    h = jax.nn.relu(h @ p["w3"] + p["b3"])
    adv = jax.nn.relu(h @ p["wa1"] + p["ba1"]) @ p["wa2"] + p["ba2"]
    val = jax.nn.relu(h @ p["wv1"] + p["bv1"]) @ p["wv2"] + p["bv2"]
    return val + adv - jnp.mean(adv)


def reference_forward_bf16(x, pk, num_actions):
    """Pure-JAX reference mirroring the kernel's bf16/f32 arithmetic on packed params."""
    def mm(a, w):
        return jnp.dot(a.astype(jnp.bfloat16), w, preferred_element_type=jnp.float32)

    tw = pk["trunk_w"]
    bv = pk["biases"]
    h = jax.nn.relu(mm(x, tw[0:16]) + bv[0:1, 0:64])
    h = jax.nn.relu(mm(h, tw[16:80]) + bv[1:2, 0:64])
    h = jax.nn.relu(mm(h, tw[80:144]) + bv[2:3, 0:64])
    y1 = jax.nn.relu(mm(h, pk["head1_w"]) + bv[3:4, :])
    y2 = mm(y1, pk["head2_w"]) + bv[4:5, 0:128]
    adv = y2[:, :num_actions]
    val = y2[:, num_actions:num_actions + 1]
    return val + adv - jnp.mean(adv)


# ---------------------------------------------------------------------------
if __name__ == "__main__":
    in_features = 16     # input_shape = (16,)
    num_actions = 8

    key = jax.random.PRNGKey(0)
    k_params, k_x = jax.random.split(key)
    params = init_params(k_params, in_features, num_actions)
    packed = pack_params(params, num_actions)

    # Main case: batch = 8 (full sublane tile, no padding path).
    batch = 8
    x = jax.random.normal(k_x, (batch, in_features), jnp.float32)

    out = dueling_dqn_forward(x, packed, num_actions)
    out = jax.block_until_ready(out)
    assert out.shape == (batch, num_actions)

    ref_bf16 = reference_forward_bf16(x, packed, num_actions)
    assert jnp.allclose(out, ref_bf16, atol=2e-3, rtol=2e-3), (out, ref_bf16)

    ref_f32 = reference_forward_f32(x, params)
    assert jnp.allclose(out, ref_f32, atol=5e-2), (out, ref_f32)

    # Secondary case: batch = 2 exercises the sublane-pad + masked-mean path.
    x2 = x[:2]
    out2 = jax.block_until_ready(dueling_dqn_forward(x2, packed, num_actions))
    assert out2.shape == (2, num_actions)
    ref2_bf16 = reference_forward_bf16(x2, packed, num_actions)
    assert jnp.allclose(out2, ref2_bf16, atol=2e-3, rtol=2e-3), (out2, ref2_bf16)
    ref2_f32 = reference_forward_f32(x2, params)
    assert jnp.allclose(out2, ref2_f32, atol=5e-2), (out2, ref2_f32)

    print("KERNEL_OK")
</pallas_src>

<mosaic_0001>
module attributes {stable_mosaic.version = 11 : i64} {
  func.func @dueling_dqn_kernel(%arg0: memref<8x16xf32, #tpu.memory_space<vmem>>, %arg1: memref<144x64xbf16, #tpu.memory_space<vmem>>, %arg2: memref<64x1024xbf16, #tpu.memory_space<vmem>>, %arg3: memref<1024x128xbf16, #tpu.memory_space<vmem>>, %arg4: memref<8x1024xf32, #tpu.memory_space<vmem>>, %arg5: memref<8x128xf32, #tpu.memory_space<vmem>>) attributes {dimension_semantics = [], scalar_prefetch = 0 : i64, scratch_operands = 0 : i64, tpu.core_type = #tpu.core_type<tc>} {
    %c0 = arith.constant 0 : index
    %c0_0 = arith.constant 0 : index
    %0 = vector.load %arg1[%c0, %c0_0] : memref<144x64xbf16, #tpu.memory_space<vmem>>, vector<144x64xbf16>
    %c0_1 = arith.constant 0 : index
    %c0_2 = arith.constant 0 : index
    %1 = vector.load %arg4[%c0_1, %c0_2] : memref<8x1024xf32, #tpu.memory_space<vmem>>, vector<8x1024xf32>
    %2 = vector.extract_strided_slice %0 {offsets = [0, 0], sizes = [16, 64], strides = [1, 1]} : vector<144x64xbf16> to vector<16x64xbf16>
    %3 = vector.extract_strided_slice %0 {offsets = [16, 0], sizes = [64, 64], strides = [1, 1]} : vector<144x64xbf16> to vector<64x64xbf16>
    %4 = vector.extract_strided_slice %0 {offsets = [80, 0], sizes = [64, 64], strides = [1, 1]} : vector<144x64xbf16> to vector<64x64xbf16>
    %5 = vector.extract_strided_slice %1 {offsets = [0, 0], sizes = [1, 64], strides = [1, 1]} : vector<8x1024xf32> to vector<1x64xf32>
    %6 = vector.extract_strided_slice %1 {offsets = [1, 0], sizes = [1, 64], strides = [1, 1]} : vector<8x1024xf32> to vector<1x64xf32>
    %7 = vector.extract_strided_slice %1 {offsets = [2, 0], sizes = [1, 64], strides = [1, 1]} : vector<8x1024xf32> to vector<1x64xf32>
    %8 = vector.extract_strided_slice %1 {offsets = [3, 0], sizes = [1, 1024], strides = [1, 1]} : vector<8x1024xf32> to vector<1x1024xf32>
    %9 = vector.extract_strided_slice %1 {offsets = [4, 0], sizes = [1, 128], strides = [1, 1]} : vector<8x1024xf32> to vector<1x128xf32>
    %c0_3 = arith.constant 0 : index
    %c0_4 = arith.constant 0 : index
    %10 = vector.load %arg0[%c0_3, %c0_4] : memref<8x16xf32, #tpu.memory_space<vmem>>, vector<8x16xf32>
    %11 = arith.truncf %10 : vector<8x16xf32> to vector<8x16xbf16>
    %cst = arith.constant dense<0.000000e+00> : vector<8x64xf32>
    %12 = tpu.matmul %11, %2, %cst {dimension_numbers = #tpu.dot_dimension_numbers<[1], [0], [0], [1], [0, 0, 1, 1], [], []>} : vector<8x16xbf16>, vector<16x64xbf16>, vector<8x64xf32> -> vector<8x64xf32>
    %13 = vector.broadcast %5 : vector<1x64xf32> to vector<8x64xf32>
    %14 = arith.addf %12, %13 : vector<8x64xf32>
    %cst_5 = arith.constant 0.000000e+00 : f32
    %15 = vector.broadcast %cst_5 : f32 to vector<8x64xf32>
    %16 = arith.maximumf %14, %15 : vector<8x64xf32>
    %17 = arith.truncf %16 : vector<8x64xf32> to vector<8x64xbf16>
    %cst_6 = arith.constant dense<0.000000e+00> : vector<8x64xf32>
    %18 = tpu.matmul %17, %3, %cst_6 {dimension_numbers = #tpu.dot_dimension_numbers<[1], [0], [0], [1], [0, 0, 1, 1], [], []>} : vector<8x64xbf16>, vector<64x64xbf16>, vector<8x64xf32> -> vector<8x64xf32>
    %19 = vector.broadcast %6 : vector<1x64xf32> to vector<8x64xf32>
    %20 = arith.addf %18, %19 : vector<8x64xf32>
    %cst_7 = arith.constant 0.000000e+00 : f32
    %21 = vector.broadcast %cst_7 : f32 to vector<8x64xf32>
    %22 = arith.maximumf %20, %21 : vector<8x64xf32>
    %23 = arith.truncf %22 : vector<8x64xf32> to vector<8x64xbf16>
    %cst_8 = arith.constant dense<0.000000e+00> : vector<8x64xf32>
    %24 = tpu.matmul %23, %4, %cst_8 {dimension_numbers = #tpu.dot_dimension_numbers<[1], [0], [0], [1], [0, 0, 1, 1], [], []>} : vector<8x64xbf16>, vector<64x64xbf16>, vector<8x64xf32> -> vector<8x64xf32>
    %25 = vector.broadcast %7 : vector<1x64xf32> to vector<8x64xf32>
    %26 = arith.addf %24, %25 : vector<8x64xf32>
    %cst_9 = arith.constant 0.000000e+00 : f32
    %27 = vector.broadcast %cst_9 : f32 to vector<8x64xf32>
    %28 = arith.maximumf %26, %27 : vector<8x64xf32>
    %29 = arith.truncf %28 : vector<8x64xf32> to vector<8x64xbf16>
    %c0_10 = arith.constant 0 : index
    %c0_11 = arith.constant 0 : index
    %30 = vector.load %arg2[%c0_10, %c0_11] : memref<64x1024xbf16, #tpu.memory_space<vmem>>, vector<64x1024xbf16>
    %cst_12 = arith.constant dense<0.000000e+00> : vector<8x1024xf32>
    %31 = tpu.matmul %29, %30, %cst_12 {dimension_numbers = #tpu.dot_dimension_numbers<[1], [0], [0], [1], [0, 0, 1, 1], [], []>} : vector<8x64xbf16>, vector<64x1024xbf16>, vector<8x1024xf32> -> vector<8x1024xf32>
    %32 = vector.broadcast %8 : vector<1x1024xf32> to vector<8x1024xf32>
    %33 = arith.addf %31, %32 : vector<8x1024xf32>
    %cst_13 = arith.constant 0.000000e+00 : f32
    %34 = vector.broadcast %cst_13 : f32 to vector<8x1024xf32>
    %35 = arith.maximumf %33, %34 : vector<8x1024xf32>
    %36 = arith.truncf %35 : vector<8x1024xf32> to vector<8x1024xbf16>
    %c0_14 = arith.constant 0 : index
    %c0_15 = arith.constant 0 : index
    %37 = vector.load %arg3[%c0_14, %c0_15] : memref<1024x128xbf16, #tpu.memory_space<vmem>>, vector<1024x128xbf16>
    %cst_16 = arith.constant dense<0.000000e+00> : vector<8x128xf32>
    %38 = tpu.matmul %36, %37, %cst_16 {dimension_numbers = #tpu.dot_dimension_numbers<[1], [0], [0], [1], [0, 0, 1, 1], [], []>} : vector<8x1024xbf16>, vector<1024x128xbf16>, vector<8x128xf32> -> vector<8x128xf32>
    %39 = vector.broadcast %9 : vector<1x128xf32> to vector<8x128xf32>
    %40 = arith.addf %38, %39 : vector<8x128xf32>
    %41 = tpu.iota {dimensions = array<i32: 1>} : vector<8x128xi32>
    %42 = tpu.iota {dimensions = array<i32: 0>} : vector<8x128xi32>
    %c8_i32 = arith.constant 8 : i32
    %43 = vector.broadcast %c8_i32 : i32 to vector<8x128xi32>
    %44 = arith.cmpi slt, %41, %43 : vector<8x128xi32>
    %c8_i32_17 = arith.constant 8 : i32
    %45 = vector.broadcast %c8_i32_17 : i32 to vector<8x128xi32>
    %46 = arith.cmpi slt, %42, %45 : vector<8x128xi32>
    %47 = arith.andi %44, %46 : vector<8x128xi1>
    %cst_18 = arith.constant 0.000000e+00 : f32
    %48 = vector.broadcast %cst_18 : f32 to vector<8x128xf32>
    %49 = arith.select %47, %40, %48 : vector<8x128xi1>, vector<8x128xf32>
    %50 = vector.shape_cast %49 : vector<8x128xf32> to vector<1x8x128xf32>
    %cst_19 = arith.constant dense<0.000000e+00> : vector<1xf32>
    %51 = vector.multi_reduction <add>, %50, %cst_19 [1, 2] : vector<1x8x128xf32> to vector<1xf32>
    %52 = vector.shape_cast %51 : vector<1xf32> to vector<1x1x1xf32>
    %53 = vector.extract %52[0, 0, 0] : f32 from vector<1x1x1xf32>
    %cst_20 = arith.constant 1.562500e-02 : f32
    %54 = arith.mulf %53, %cst_20 : f32
    %c8_i32_21 = arith.constant 8 : i32
    %55 = vector.broadcast %c8_i32_21 : i32 to vector<8x128xi32>
    %56 = arith.cmpi eq, %41, %55 : vector<8x128xi32>
    %cst_22 = arith.constant 0.000000e+00 : f32
    %57 = vector.broadcast %cst_22 : f32 to vector<8x128xf32>
    %58 = arith.select %56, %40, %57 : vector<8x128xi1>, vector<8x128xf32>
    %cst_23 = arith.constant dense<0.000000e+00> : vector<8xf32>
    %59 = vector.multi_reduction <add>, %58, %cst_23 [1] : vector<8x128xf32> to vector<8xf32>
    %60 = vector.shape_cast %59 : vector<8xf32> to vector<8x1xf32>
    %61 = vector.broadcast %60 : vector<8x1xf32> to vector<8x128xf32>
    %62 = arith.addf %40, %61 : vector<8x128xf32>
    %63 = vector.broadcast %54 : f32 to vector<8x128xf32>
    %64 = arith.subf %62, %63 : vector<8x128xf32>
    %c0_24 = arith.constant 0 : index
    %c0_25 = arith.constant 0 : index
    %65 = vector.load %arg5[%c0_24, %c0_25] : memref<8x128xf32, #tpu.memory_space<vmem>>, vector<8x128xf32>
    tpu.vector_store %arg5[%c0_24, %c0_25], %64 {strides = array<i32>} : memref<8x128xf32, #tpu.memory_space<vmem>>, vector<8x128xf32>,
    return
  }
}

</mosaic_0001>

<bundles_post_ra>
// kernel: tpu_custom_call.1
= control target key start
LH: loop header
LB: loop body
LE: loop exit
PB: predicated region body
PF: predicated region fallthrough
CT: control target
= control target key end

     0   :  { %10 = vsyncpa [#allocation3], 0  ;;  %s1934_s0 = inlined_call_operand.vmem [shape: f32[8,16], index: 0, kind: input, shape index: {}]   ;;  %s1935_s1 = inlined_call_operand.vmem [shape: bf16[144,64], index: 1, kind: input, shape index: {}]   ;;  %s1936_s2 = inlined_call_operand.hbm [shape: bf16[64,1024], index: 2, kind: input, shape index: {}]   ;;  %s1937_s3 = inlined_call_operand.hbm [shape: bf16[1024,128], index: 3, kind: input, shape index: {}]   ;;  %s1938_s4 = inlined_call_operand.vmem [shape: f32[8,1024], index: 4, kind: input, shape index: {}]   ;;  %s1939_s5 = inlined_call_operand.hbm [shape: f32[8,128], index: 5, kind: output, shape index: {}]  }
   0x1   :  { %11 = vsyncpa [#allocation6], 0 }
   0x2   :  { %12 = vsyncpa [#allocation4], 0  ;;  %s1799_s18 = smov [#allocation2]  }
   0x3   :  { %s22_s19 = sshll.u32 %s1799_s18, 4  ;;  %s23_s19 = int_to_ptr.vmem [resolvable:$true] %s22_s19 }
   0x4   :  { %s1741_s20 = scalar_lea.vmem %s23_s19, 4096  ;;  %p1746_p1 = scmp.lt.s32.totalorder %s23_s19, %s23_s19 }
   0x5   :  { %p1742_p0 = scmp.ne.s32.totalorder %s23_s19, %s1741_s20  ;;  %p1747_p2 = scmp.lt.s32.totalorder %s1741_s20, %s1741_s20 }
   0x7   :  { %p1748_p3 = por %p1747_p2, %p1746_p1 }
   0x9   :  { %p1749_p4 = pnand %p1748_p3, %p1742_p0 }
   0xb   :  { %1752 = shalt.err (!%p1749_p4)
}
   0xc   :  { %s1800_s21 = smov 512   ;;  %s1801_s22 = smov 32  }
   0xd   :  { %28 = dma.hbm_to_vmem [thread:$0]  %s1936_s2, 4096, %s23_s19, [#allocation3], %s1800_s21, %s1800_s21, %s1801_s22  }
   0xe   :  { %s1802_s25 = smov [#allocation5]  }
   0xf   :  { %s34_s26 = sshll.u32 %s1802_s25, 4  ;;  %s35_s26 = int_to_ptr.vmem [resolvable:$true] %s34_s26 }
  0x10   :  { %s1761_s27 = scalar_lea.vmem %s35_s26, 8192  ;;  %p1766_p6 = scmp.lt.s32.totalorder %s35_s26, %s35_s26 }
  0x11   :  { %p1762_p5 = scmp.ne.s32.totalorder %s35_s26, %s1761_s27  ;;  %p1767_p7 = scmp.lt.s32.totalorder %s1761_s27, %s1761_s27 }
  0x13   :  { %p1768_p8 = por %p1767_p7, %p1766_p6 }
  0x15   :  { %p1769_p9 = pnand %p1768_p8, %p1762_p5 }
  0x17   :  { %1772 = shalt.err (!%p1769_p9)
}
  0x18   :  { %s1803_s28 = smov 64   ;;  %s1804_s29 = smov 4  }
  0x19   :  { %40 = dma.hbm_to_vmem [thread:$0]  %s1937_s3, 8192, %s35_s26, [#allocation6], %s1803_s28, %s1803_s28, %s1804_s29  }
  0x1a   :  { %1793 = dma.done.wait [#allocation3], 4096  }
  0x1b   :  { %1794 = vsyncadd [#allocation3], 4294963200 }
  0x1c   :  { %1795 = dma.done.wait [#allocation6], 8192  }
  0x1d   :  { %1796 = vsyncadd [#allocation6], 4294959104  ;;  %v1805_v0 = vmov 0.0   ;;  %vm1806_vm0 = vmmov 0   ;;  %v1660_v1 = vld [vmem:[%s1935_s1] sm:$0xff]   ;;  %vm88_vm1 = vcmask 130048   ;;  %v78_v10 = vlaneseq }
  0x1e   :  { %1618 = vmatprep.subr.bf16.mxu0 %v1805_v0  ;;  %1620 = vmatprep.mubr.msk.bf16.mxu0 %vm1806_vm0, %v1805_v0  ;;  %v76_v2 = vld [vmem:[%s1934_s0] sm:$0xff]  ;;  %v1662_v5 = vld [vmem:[%s1935_s1 + $0x18] sm:$0xff]   ;;  %v1663_v6 = vld [vmem:[%s1935_s1 + $0x10] sm:$0xff]   ;;  %vm162_vm2 = vcmask 523264   ;;  %s1808_s13 = smov [#allocation7]  }
  0x1f   :  { %1624 = vmatprep.subr.bf16.mxu1 %v1805_v0  ;;  %1632 = vmatprep.mubr.msk.bf16.mxu1 %vm1806_vm0, %v1805_v0  ;;  %v77_v3 = vpack.c.bf16 %v76_v2, %v76_v2  ;;  %v1661_v4 = vld [vmem:[%s1935_s1 + $0x20] sm:$0xff]   ;;  %v1664_v7 = vld [vmem:[%s1935_s1 + $0x8] sm:$0xff]   ;;  %v1666_v9 = vld [vmem:[%s1935_s1 + $0x38] sm:$0xff]   ;;  %v1870_v11 = vshrl.u32 %v78_v10, 7  ;;  %s1396_s0 = sshll.u32 %s1808_s13, 4  ;;  %s1397_s0 = int_to_ptr.vmem [resolvable:$true] %s1396_s0 }
  0x20   :  { %1619 = vmatpush3.bf16.msra.mxu0 %v1660_v1  ;;  %1625 = vmatpush3.bf16.msra.mxu1 %v1661_v4  ;;  %v1665_v8 = vld [vmem:[%s1935_s1 + $0x40] sm:$0xff]   ;;  %v1667_v22 = vld [vmem:[%s1935_s1 + $0x30] sm:$0xff]   ;;  %v1668_v23 = vld [vmem:[%s1935_s1 + $0x28] sm:$0xff]   ;;  %s1773_s14 = scalar_lea.vmem %s1397_s0, 128  ;;  %p1778_p11 = scmp.lt.s32.totalorder %s1397_s0, %s1397_s0 }
  0x21   :  { %1636 = vmatprep.subr.bf16.mxu0 %v1805_v0  ;;  %1626 = vmatprep.subr.bf16.mxu1 %v1805_v0  ;;  %v80_v12 = vsub.s32 0, %v1870_v11  ;;  %v1876_v13 = vld [vmem:[%s1938_s4] sm:$0xff]  ;;  %v306_v26 = vld [vmem:[#allocation2 + $0xc8] sm:$0xff]  ;;  %v136_v40 = vsub.s32 1, %v1870_v11  ;;  %v307_v1 = vld [vmem:[#allocation2 + $0xd0] sm:$0xff]  ;;  %p1774_p10 = scmp.ne.s32.totalorder %s1397_s0, %s1773_s14  ;;  %p1779_p12 = scmp.lt.s32.totalorder %s1773_s14, %s1773_s14 }
  0x22   :  { %v305_v24 = vld [vmem:[#allocation2 + $0xc0] sm:$0xff]  ;;  %v310_v29 = vld [vmem:[#allocation2 + $0xe8] sm:$0xff]  ;;  %v311_v2 = vld [vmem:[#allocation2 + $0xf0] sm:$0xff] }
  0x23   :  { %1621 = vmatmul.mubr.msk.bf16.vlgmr.msra.gmra.mxu0 %vm88_vm1, %v77_v3  ;;  %v81_v14 = vrot.slane %v1876_v13, %v80_v12  ;;  %v309_v25 = vld [vmem:[#allocation2 + $0xe0] sm:$0xff]  ;;  %v1444_v32 = vcombine.low %v306_v26, %v310_v29  ;;  %v1445_v33 = vcombine.high %v306_v26, %v310_v29  ;;  %v137_v41 = vrot.slane %v1876_v13, %v136_v40  ;;  %v298_v45 = vld [vmem:[#allocation2 + $0x88] sm:$0xff]  ;;  %v308_v3 = vld [vmem:[#allocation2 + $0xd8] sm:$0xff]  ;;  %p1780_p13 = por %p1779_p12, %p1778_p11 }
  0x24   :  { %1644 = vmatprep.mubr.msk.bf16.mxu0 %vm1806_vm0, %v1805_v0  ;;  %1627 = vmatpush3.bf16.msra.mxu1 %v1662_v5  ;;  %v1442_v27 = vcombine.low %v305_v24, %v309_v25  ;;  %v1443_v28 = vcombine.high %v305_v24, %v309_v25  ;;  %v297_v30 = vld [vmem:[#allocation2 + $0x80] sm:$0xff]  ;;  %v302_v46 = vld [vmem:[#allocation2 + $0xa8] sm:$0xff]  ;;  %v1447_v4 = vcombine.high %v307_v1, %v311_v2  ;;  %v312_v5 = vld [vmem:[#allocation2 + $0xf8] sm:$0xff]  ;;  %v210_v12 = vsub.s32 2, %v1870_v11 }
  0x25   :  { %1628 = vmatprep.subr.bf16.mxu1 %v1805_v0  ;;  %1637 = vmatpush3.bf16.msra.mxu0 %v1665_v8  ;;  %v301_v31 = vld [vmem:[#allocation2 + $0xa0] sm:$0xff]  ;;  %v1437_v50 = vcombine.high %v298_v45, %v302_v46  ;;  %v290_v52 = vld [vmem:[#allocation2 + $0x48] sm:$0xff]  ;;  %v1436_v54 = vcombine.low %v298_v45, %v302_v46  ;;  %v1449_v8 = vcombine.high %v308_v3, %v312_v5  ;;  %v295_v29 = vld [vmem:[#allocation2 + $0x70] sm:$0xff]  ;;  %p1781_p0 = pnand %p1780_p13, %p1774_p10 }
  0x26   :  { %1638 = vmatprep.subr.bf16.mxu0 %v1805_v0  ;;  %v1435_v34 = vcombine.high %v297_v30, %v301_v31  ;;  %v1434_v35 = vcombine.low %v297_v30, %v301_v31  ;;  %v289_v36 = vld [vmem:[#allocation2 + $0x40] sm:$0xff]  ;;  %v294_v53 = vld [vmem:[#allocation2 + $0x68] sm:$0xff]  ;;  %v292_v30 = vld [vmem:[#allocation2 + $0x58] sm:$0xff] }
  0x27   :  { %v293_v37 = vld [vmem:[#allocation2 + $0x60] sm:$0xff]  ;;  %v1429_v55 = vcombine.high %v290_v52, %v294_v53  ;;  %v1428_v56 = vcombine.low %v290_v52, %v294_v53  ;;  %v282_v59 = vld [vmem:[#allocation2 + $0x8] sm:$0xff]  ;;  %v296_v31 = vld [vmem:[#allocation2 + $0x78] sm:$0xff] }
  0x28   :  { %1629 = vmatpush3.bf16.msra.mxu1 %v1663_v6  ;;  %v1427_v38 = vcombine.high %v289_v36, %v293_v37  ;;  %v1426_v39 = vcombine.low %v289_v36, %v293_v37  ;;  %v281_v57 = vld [vmem:[#allocation2] sm:$0xff]  ;;  %v286_v61 = vld [vmem:[#allocation2 + $0x28] sm:$0xff]  ;;  %v1446_v6 = vcombine.low %v307_v1, %v311_v2  ;;  %v283_v36 = vld [vmem:[#allocation2 + $0x10] sm:$0xff] }
  0x29   :  { %1630 = vmatprep.subr.bf16.mxu1 %v1805_v0  ;;  %1639 = vmatpush3.bf16.msra.mxu0 %v1666_v9  ;;  %v285_v58 = vld [vmem:[#allocation2 + $0x20] sm:$0xff]  ;;  %v1420_v63 = vcombine.low %v282_v59, %v286_v61  ;;  %v1807_v9 = vmov 0   ;;  %v287_v37 = vld [vmem:[#allocation2 + $0x30] sm:$0xff]  ;;  %v1669_v46 = vld [vmem:[#allocation5 + $0x78] sm:$0xff]  }
  0x2a   :  { %1640 = vmatprep.subr.bf16.mxu0 %v1805_v0  ;;  %v1419_v60 = vcombine.high %v281_v57, %v285_v58  ;;  %v1418_v62 = vcombine.low %v281_v57, %v285_v58  ;;  %v1675_v52 = vld [vmem:[#allocation5 + $0x30] sm:$0xff]   ;;  %v1680_v57 = vld [vmem:[#allocation5 + $0xa8] sm:$0xff]   ;;  %v1681_v58 = vld [vmem:[#allocation5 + $0x60] sm:$0xff]  }
  0x2b   :  { %v1676_v53 = vld [vmem:[#allocation5 + $0xb0] sm:$0xff]   ;;  %v1688_v1 = vld [vmem:[#allocation5 + $0x98] sm:$0xff]  }
  0x2c   :  { %1631 = vmatpush3.bf16.msra.mxu1 %v1664_v7  ;;  %v1448_v7 = vcombine.low %v308_v3, %v312_v5  ;;  %v1689_v2 = vld [vmem:[#allocation5 + $0x50] sm:$0xff]  }
  0x2d   :  { %1641 = vmatpush3.bf16.msra.mxu0 %v1667_v22  ;;  %516 = vmatprep.subr.bf16.mxu1 %v1443_v28  ;;  %v1690_v3 = vld [vmem:[#allocation5 + $0xd0] sm:$0xff]  }
  0x2e   :  { %1642 = vmatprep.subr.bf16.mxu0 %v1805_v0  ;;  %v1421_v0 = vcombine.high %v282_v59, %v286_v61  ;;  %v1682_v59 = vld [vmem:[#allocation5 + $0xe0] sm:$0xff]   ;;  %v1692_v5 = vld [vmem:[#allocation5 + $0x90] sm:$0xff]  }
  0x2f   :  { %v1684_v61 = vld [vmem:[#allocation5 + $0xa0] sm:$0xff]  }
  0x31   :  { %1643 = vmatpush3.bf16.msra.mxu0 %v1668_v23 }
  0x32   :  { %557 = vmatprep.subr.bf16.mxu0 %v1445_v33 }
  0xe3   :  { %v126_v15 = vpop.f32.mrf.mxu0 }
  0xe4   :  { %v127_v16 = vadd.f32 %v126_v15, %v81_v14  ;;  %v211_v14 = vrot.slane %v1876_v13, %v210_v12  ;;  %v1697_v12 = vld [vmem:[#allocation5 + $0x40] sm:$0xff]  }
  0xe5   :  { %v1622_v17 = vpop.f32.mrf.mxu0 }
  0xe6   :  { %v132_v18 = vmax.f32 %v127_v16, 0.0  ;;  %v299_v17 = vld [vmem:[#allocation2 + $0x90] sm:$0xff] }
  0xe7   :  { %v129_v19 = vpop.f32.mrf.mxu0 }
  0xe8   :  { %v133_v20 = vpack.c.bf16 %v132_v18, %v132_v18  ;;  %v303_v19 = vld [vmem:[#allocation2 + $0xb0] sm:$0xff] }
  0xe9   :  { %v1623_v21 = vpop.f32.mrf.mxu0  ;;  %v1439_v25 = vcombine.high %v299_v17, %v303_v19 }
  0xea   :  { %1633 = vmatmul.mubr.msk.bf16.vlgmr.msra.gmra.mxu1 %vm162_vm2, %v133_v20  ;;  %v300_v20 = vld [vmem:[#allocation2 + $0x98] sm:$0xff] }
  0xeb   :  { %517 = vmatpush1.bf16.msra.mxu1 %v1442_v27  ;;  %540 = vmatprep.mubr.bf16.mxu1 %v1807_v9  ;;  %v304_v21 = vld [vmem:[#allocation2 + $0xb8] sm:$0xff]  ;;  %v291_v27 = vld [vmem:[#allocation2 + $0x50] sm:$0xff] }
  0xec   :  { %518 = vmatprep.subr.bf16.mxu1 %v1435_v34  ;;  %v1441_v26 = vcombine.high %v300_v20, %v304_v21  ;;  %v1440_v33 = vcombine.low %v300_v20, %v304_v21  ;;  %v1431_v34 = vcombine.high %v291_v27, %v295_v29  ;;  %v1430_v40 = vcombine.low %v291_v27, %v295_v29  ;;  %v70_v20 = vld [vmem:[%s1938_s4 + $0x10] sm:$0xff]  ;;  %v69_v21 = vld [vmem:[%s1938_s4 + $0x8] sm:$0xff] }
  0xef   :  { %519 = vmatpush1.bf16.msra.mxu1 %v1434_v35  ;;  %v1433_v35 = vcombine.high %v292_v30, %v296_v31 }
  0xf0   :  { %520 = vmatprep.subr.bf16.mxu1 %v1427_v38  ;;  %v284_v38 = vld [vmem:[#allocation2 + $0x18] sm:$0xff] }
  0xf3   :  { %521 = vmatpush1.bf16.msra.mxu1 %v1426_v39  ;;  %v288_v39 = vld [vmem:[#allocation2 + $0x38] sm:$0xff] }
  0xf4   :  { %522 = vmatprep.subr.bf16.mxu1 %v1419_v60  ;;  %v1424_v45 = vcombine.low %v284_v38, %v288_v39  ;;  %v1683_v60 = vld [vmem:[#allocation5 + $0x20] sm:$0xff]  }
  0xf7   :  { %523 = vmatpush1.bf16.msra.mxu1 %v1418_v62  ;;  %v1685_v62 = vld [vmem:[#allocation5 + $0x58] sm:$0xff]  }
  0xf8   :  { %598 = vmatprep.subr.bf16.mxu1 %v1447_v4  ;;  %v1691_v4 = vld [vmem:[#allocation5 + $0x10] sm:$0xff]  }
 0x1aa   :  { %v200_v42 = vpop.f32.mrf.mxu1 }
 0x1ab   :  { %v201_v43 = vadd.f32 %v200_v42, %v137_v41  ;;  %v1432_v41 = vcombine.low %v292_v30, %v296_v31  ;;  %v1423_v42 = vcombine.high %v283_v36, %v287_v37 }
 0x1ac   :  { %v1634_v44 = vpop.f32.mrf.mxu1 }
 0x1ad   :  { %v206_v47 = vmax.f32 %v201_v43, 0.0  ;;  %v1425_v43 = vcombine.high %v284_v38, %v288_v39  ;;  %v1422_v44 = vcombine.low %v283_v36, %v287_v37 }
 0x1ae   :  { %v203_v48 = vpop.f32.mrf.mxu1 }
 0x1af   :  { %v207_v49 = vpack.c.bf16 %v206_v47, %v206_v47  ;;  %v1670_v47 = vld [vmem:[#allocation5 + $0xf8] sm:$0xff]  }
 0x1b0   :  { %v1635_v51 = vpop.f32.mrf.mxu1  ;;  %v1671_v48 = vld [vmem:[#allocation5 + $0x38] sm:$0xff]  }
 0x1b1   :  { %1645 = vmatmul.mubr.msk.bf16.vlgmr.msra.gmra.mxu0 %vm162_vm2, %v207_v49  ;;  %v1672_v49 = vld [vmem:[#allocation5 + $0xb8] sm:$0xff]   ;;  %v1674_v51 = vld [vmem:[#allocation5 + $0xf0] sm:$0xff]  }
 0x1b2   :  { %558 = vmatpush1.bf16.msra.mxu0 %v1444_v32  ;;  %581 = vmatprep.mubr.bf16.mxu0 %v1807_v9  ;;  %v1438_v32 = vcombine.low %v299_v17, %v303_v19  ;;  %v1701_v17 = vld [vmem:[#allocation5 + $0x178] sm:$0xff]   ;;  %v1896_v19 = vsub.s32 3, %v1870_v11 }
 0x1b3   :  { %559 = vmatprep.subr.bf16.mxu0 %v1437_v50  ;;  %v1673_v50 = vld [vmem:[#allocation5 + $0x70] sm:$0xff]  }
 0x1b6   :  { %560 = vmatpush1.bf16.msra.mxu0 %v1436_v54  ;;  %v1677_v54 = vld [vmem:[#allocation5 + $0x68] sm:$0xff]  }
 0x1b7   :  { %561 = vmatprep.subr.bf16.mxu0 %v1429_v55  ;;  %v1678_v55 = vld [vmem:[#allocation5 + $0xe8] sm:$0xff]  }
 0x1ba   :  { %562 = vmatpush1.bf16.msra.mxu0 %v1428_v56  ;;  %v1679_v56 = vld [vmem:[#allocation5 + $0x28] sm:$0xff]  }
 0x1bb   :  { %563 = vmatprep.subr.bf16.mxu0 %v1421_v0  ;;  %v1687_v0 = vld [vmem:[#allocation5 + $0x18] sm:$0xff]  }
 0x1be   :  { %564 = vmatpush1.bf16.msra.mxu0 %v1420_v63  ;;  %v1686_v63 = vld [vmem:[#allocation5 + $0xd8] sm:$0xff]  }
 0x1bf   :  { %639 = vmatprep.subr.bf16.mxu0 %v1449_v8  ;;  %v1695_v8 = vld [vmem:[#allocation5 + $0x8] sm:$0xff]  }
 0x271   :  { %v273_v15 = vpop.f32.mrf.mxu0 }
 0x272   :  { %v274_v16 = vadd.f32 %v273_v15, %v211_v14  ;;  %v1698_v14 = vld [vmem:[#allocation5 + $0xc0] sm:$0xff]  }
 0x273   :  { %v1646_v18 = vpop.f32.mrf.mxu0  ;;  %v1699_v15 = vld [vmem:[#allocation5] sm:$0xff]  }
 0x274   :  { %v279_v22 = vmax.f32 %v274_v16, 0.0  ;;  %v1700_v16 = vld [vmem:[#allocation5 + $0x80] sm:$0xff]   ;;  %v1702_v18 = vld [vmem:[#allocation5 + $0x1f8] sm:$0xff]  }
 0x275   :  { %v276_v23 = vpop.f32.mrf.mxu0 }
 0x276   :  { %v280_v24 = vpack.c.bf16 %v279_v22, %v279_v22  ;;  %v71_v22 = vld [vmem:[%s1938_s4 + $0x18] sm:$0xff]  ;;  %v316_v23 = vrot.slane %v1876_v13, %v1896_v19 }
 0x277   :  { %v1647_v28 = vpop.f32.mrf.mxu0 }
 0x278   :  { %1450 = vmatmul.mubr.msk.bf16.vlgmr.msra.gmra.mxu1 %vm162_vm2, %v280_v24  ;;  %1451 = vmatmul.mubr.msk.bf16.vlgmr.msra.gmra.mxu0 %vm162_vm2, %v280_v24 }
 0x279   :  { %599 = vmatpush1.bf16.msra.mxu1 %v1446_v6  ;;  %640 = vmatpush1.bf16.msra.mxu0 %v1448_v7  ;;  %v1693_v6 = vld [vmem:[#allocation5 + $0x48] sm:$0xff]  }
 0x27a   :  { %600 = vmatprep.subr.bf16.mxu1 %v1439_v25  ;;  %641 = vmatprep.subr.bf16.mxu0 %v1441_v26  ;;  %v1694_v7 = vld [vmem:[#allocation5 + $0xc8] sm:$0xff]   ;;  %v320_v25 = vrot.slane %v69_v21, %v1896_v19  ;;  %v328_v26 = vrot.slane %v71_v22, %v1896_v19  ;;  %v1719_v21 = vld [vmem:[#allocation5 + $0x118] sm:$0xff]  }
 0x27b   :  { %622 = vmatprep.mubr.bf16.mxu1 %v1807_v9  ;;  %663 = vmatprep.mubr.bf16.mxu0 %v1807_v9  ;;  %v1696_v9 = vld [vmem:[#allocation5 + $0x88] sm:$0xff]   ;;  %v1720_v22 = vld [vmem:[#allocation5 + $0x198] sm:$0xff]  }
 0x27d   :  { %601 = vmatpush1.bf16.msra.mxu1 %v1438_v32  ;;  %642 = vmatpush1.bf16.msra.mxu0 %v1440_v33 }
 0x27e   :  { %602 = vmatprep.subr.bf16.mxu1 %v1431_v34  ;;  %643 = vmatprep.subr.bf16.mxu0 %v1433_v35 }
 0x281   :  { %603 = vmatpush1.bf16.msra.mxu1 %v1430_v40  ;;  %644 = vmatpush1.bf16.msra.mxu0 %v1432_v41 }
 0x282   :  { %604 = vmatprep.subr.bf16.mxu1 %v1423_v42  ;;  %645 = vmatprep.subr.bf16.mxu0 %v1425_v43 }
 0x285   :  { %605 = vmatpush1.bf16.msra.mxu1 %v1422_v44  ;;  %646 = vmatpush1.bf16.msra.mxu0 %v1424_v45  ;;  %v1703_v45 = vld [vmem:[#allocation5 + $0x138] sm:$0xff]  }
 0x286   :  { %1530 = vmatprep.subr.bf16.mxu1 %v1669_v46  ;;  %1552 = vmatprep.subr.bf16.mxu0 %v1670_v47  ;;  %v1704_v46 = vld [vmem:[#allocation5 + $0x1b8] sm:$0xff]  }
 0x288   :  { %1452 = vmatmul.mubr.msk.bf16.vlgmr.msra.gmra.mxu1 %vm162_vm2, %v280_v24  ;;  %1453 = vmatmul.mubr.msk.bf16.vlgmr.msra.gmra.mxu0 %vm162_vm2, %v280_v24  ;;  %v324_v24 = vrot.slane %v70_v20, %v1896_v19 }
 0x289   :  { %1531 = vmatpush3.bf16.msra.mxu1 %v1671_v48  ;;  %1553 = vmatpush3.bf16.msra.mxu0 %v1672_v49  ;;  %v1705_v49 = vld [vmem:[#allocation5 + $0x170] sm:$0xff]  }
 0x28a   :  { %1532 = vmatprep.subr.bf16.mxu1 %v1673_v50  ;;  %1554 = vmatprep.subr.bf16.mxu0 %v1674_v51  ;;  %v1706_v50 = vld [vmem:[#allocation5 + $0x1f0] sm:$0xff]  }
 0x28b   :  { %v1707_v51 = vld [vmem:[#allocation5 + $0x130] sm:$0xff]  }
 0x28d   :  { %1533 = vmatpush3.bf16.msra.mxu1 %v1675_v52  ;;  %1555 = vmatpush3.bf16.msra.mxu0 %v1676_v53  ;;  %v1708_v52 = vld [vmem:[#allocation5 + $0x1b0] sm:$0xff]   ;;  %v73_v53 = vld [vmem:[%s1938_s4 + $0x28] sm:$0xff] }
 0x28e   :  { %1534 = vmatprep.subr.bf16.mxu1 %v1677_v54  ;;  %1556 = vmatprep.subr.bf16.mxu0 %v1678_v55  ;;  %v75_v54 = vld [vmem:[%s1938_s4 + $0x38] sm:$0xff]  ;;  %v1709_v55 = vld [vmem:[#allocation5 + $0x168] sm:$0xff]  }
 0x291   :  { %1535 = vmatpush3.bf16.msra.mxu1 %v1679_v56  ;;  %1557 = vmatpush3.bf16.msra.mxu0 %v1680_v57  ;;  %v1710_v56 = vld [vmem:[#allocation5 + $0x1e8] sm:$0xff]   ;;  %v336_v57 = vrot.slane %v73_v53, %v1896_v19 }
 0x292   :  { %1536 = vmatprep.subr.bf16.mxu1 %v1681_v58  ;;  %1558 = vmatprep.subr.bf16.mxu0 %v1682_v59  ;;  %v344_v58 = vrot.slane %v75_v54, %v1896_v19  ;;  %v1711_v59 = vld [vmem:[#allocation5 + $0x128] sm:$0xff]  }
 0x295   :  { %1537 = vmatpush3.bf16.msra.mxu1 %v1683_v60  ;;  %1559 = vmatpush3.bf16.msra.mxu0 %v1684_v61  ;;  %v1712_v60 = vld [vmem:[#allocation5 + $0x1a8] sm:$0xff]  }
 0x296   :  { %1538 = vmatprep.subr.bf16.mxu1 %v1685_v62  ;;  %1560 = vmatprep.subr.bf16.mxu0 %v1686_v63  ;;  %v1713_v63 = vld [vmem:[#allocation5 + $0x160] sm:$0xff]  }
 0x299   :  { %1539 = vmatpush3.bf16.msra.mxu1 %v1687_v0  ;;  %1561 = vmatpush3.bf16.msra.mxu0 %v1688_v1  ;;  %v1714_v0 = vld [vmem:[#allocation5 + $0x1e0] sm:$0xff]  }
 0x29a   :  { %1540 = vmatprep.subr.bf16.mxu1 %v1689_v2  ;;  %1562 = vmatprep.subr.bf16.mxu0 %v1690_v3 }
 0x29d   :  { %1541 = vmatpush3.bf16.msra.mxu1 %v1691_v4  ;;  %1563 = vmatpush3.bf16.msra.mxu0 %v1692_v5  ;;  %v1715_v5 = vld [vmem:[#allocation5 + $0x120] sm:$0xff]  }
 0x29e   :  { %1542 = vmatprep.subr.bf16.mxu1 %v1693_v6  ;;  %1564 = vmatprep.subr.bf16.mxu0 %v1694_v7  ;;  %v1716_v6 = vld [vmem:[#allocation5 + $0x1a0] sm:$0xff]  }
 0x2a1   :  { %1543 = vmatpush3.bf16.msra.mxu1 %v1695_v8  ;;  %1565 = vmatpush3.bf16.msra.mxu0 %v1696_v9  ;;  %v1717_v9 = vld [vmem:[#allocation5 + $0x158] sm:$0xff]  }
 0x2a2   :  { %1544 = vmatprep.subr.bf16.mxu1 %v1697_v12  ;;  %1566 = vmatprep.subr.bf16.mxu0 %v1698_v14  ;;  %v1718_v12 = vld [vmem:[#allocation5 + $0x1d8] sm:$0xff]  }
 0x2a5   :  { %1545 = vmatpush3.bf16.msra.mxu1 %v1699_v15  ;;  %1567 = vmatpush3.bf16.msra.mxu0 %v1700_v16 }
 0x2a6   :  { %1574 = vmatprep.subr.bf16.mxu1 %v1701_v17  ;;  %1596 = vmatprep.subr.bf16.mxu0 %v1702_v18 }
 0x338   :  { %v542_v27 = vpop.f32.mrf.mxu1  ;;  %v583_v28 = vpop.f32.mrf.mxu0 }
 0x339   :  { %v543_v29 = vadd.f32 %v542_v27, %v316_v23  ;;  %v584_v30 = vadd.f32 %v583_v28, %v324_v24  ;;  %v1721_v23 = vld [vmem:[#allocation5 + $0x150] sm:$0xff]  }
 0x33a   :  { %v544_v31 = vpop.f32.mrf.mxu1  ;;  %v585_v32 = vpop.f32.mrf.mxu0  ;;  %v1722_v24 = vld [vmem:[#allocation5 + $0x1d0] sm:$0xff]  }
 0x33b   :  { %v545_v33 = vadd.f32 %v544_v31, %v320_v25  ;;  %v586_v34 = vadd.f32 %v585_v32, %v328_v26  ;;  %v672_v35 = vmax.f32 %v543_v29, 0.0  ;;  %v674_v36 = vmax.f32 %v584_v30, 0.0  ;;  %v72_v25 = vld [vmem:[%s1938_s4 + $0x20] sm:$0xff]  ;;  %v74_v26 = vld [vmem:[%s1938_s4 + $0x30] sm:$0xff]  ;;  %v1725_v31 = vld [vmem:[#allocation5 + $0x148] sm:$0xff]  }
 0x33c   :  { %v546_v37 = vpop.f32.mrf.mxu1  ;;  %v587_v38 = vpop.f32.mrf.mxu0  ;;  %v1723_v27 = vld [vmem:[#allocation5 + $0x110] sm:$0xff]   ;;  %v332_v29 = vrot.slane %v72_v25, %v1896_v19  ;;  %v340_v30 = vrot.slane %v74_v26, %v1896_v19  ;;  %v1726_v32 = vld [vmem:[#allocation5 + $0x1c8] sm:$0xff]  }
 0x33d   :  { %v673_v39 = vmax.f32 %v545_v33, 0.0  ;;  %v675_v40 = vmax.f32 %v586_v34, 0.0  ;;  %v680_v47 = vpack.c.bf16 %v672_v35, %v672_v35  ;;  %v682_v48 = vpack.c.bf16 %v674_v36, %v674_v36  ;;  %v1724_v28 = vld [vmem:[#allocation5 + $0x190] sm:$0xff]   ;;  %v1727_v33 = vld [vmem:[#allocation5 + $0x108] sm:$0xff]   ;;  %v1729_v37 = vld [vmem:[#allocation5 + $0x140] sm:$0xff]  }
 0x33e   :  { %v547_v41 = vpop.f32.mrf.mxu1  ;;  %v588_v42 = vpop.f32.mrf.mxu0  ;;  %v1728_v34 = vld [vmem:[#allocation5 + $0x188] sm:$0xff]   ;;  %v1730_v38 = vld [vmem:[#allocation5 + $0x1c0] sm:$0xff]  }
 0x33f   :  { %v681_v43 = vpack.c.bf16 %v673_v39, %v673_v39  ;;  %v683_v44 = vpack.c.bf16 %v675_v40, %v675_v40  ;;  %v1731_v39 = vld [vmem:[#allocation5 + $0x100] sm:$0xff]  }
 0x340   :  { %v1732_v40 = vld [vmem:[#allocation5 + $0x180] sm:$0xff]  }
 0x341   :  { %1236 = vmatprep.mubr.bf16.mxu1 %v681_v43  ;;  %1276 = vmatprep.mubr.bf16.mxu0 %v683_v44 }
 0x342   :  { %1237 = vmatmul.mubr.bf16.vlgmr.msra.gmra.mxu1 %v680_v47  ;;  %1277 = vmatmul.mubr.bf16.vlgmr.msra.gmra.mxu0 %v682_v48 }
 0x343   :  { %1575 = vmatpush3.bf16.msra.mxu1 %v1703_v45  ;;  %1597 = vmatpush3.bf16.msra.mxu0 %v1704_v46 }
 0x344   :  { %1576 = vmatprep.subr.bf16.mxu1 %v1705_v49  ;;  %1598 = vmatprep.subr.bf16.mxu0 %v1706_v50 }
 0x347   :  { %1577 = vmatpush3.bf16.msra.mxu1 %v1707_v51  ;;  %1599 = vmatpush3.bf16.msra.mxu0 %v1708_v52  ;;  %v818_v52 = vsub.s32 4, %v1870_v11 }
 0x348   :  { %v624_v61 = vpop.f32.mrf.mxu1  ;;  %v665_v62 = vpop.f32.mrf.mxu0  ;;  %1578 = vmatprep.subr.bf16.mxu1 %v1709_v55  ;;  %1600 = vmatprep.subr.bf16.mxu0 %v1710_v56 }
 0x349   :  { %v625_v35 = vadd.f32 %v624_v61, %v332_v29  ;;  %v666_v36 = vadd.f32 %v665_v62, %v340_v30  ;;  %v819_v53 = vrot.slane %v1876_v13, %v818_v52  ;;  %v1365_v61 = vand.u32 127, %v78_v10 }
 0x34a   :  { %v626_v1 = vpop.f32.mrf.mxu1  ;;  %v667_v2 = vpop.f32.mrf.mxu0 }
 0x34b   :  { %v627_v3 = vadd.f32 %v626_v1, %v336_v57  ;;  %v668_v4 = vadd.f32 %v667_v2, %v344_v58  ;;  %1579 = vmatpush3.bf16.msra.mxu1 %v1711_v59  ;;  %1601 = vmatpush3.bf16.msra.mxu0 %v1712_v60  ;;  %v676_v41 = vmax.f32 %v625_v35, 0.0  ;;  %v678_v19 = vmax.f32 %v666_v36, 0.0 }
 0x34c   :  { %v628_v7 = vpop.f32.mrf.mxu1  ;;  %v669_v8 = vpop.f32.mrf.mxu0  ;;  %1580 = vmatprep.subr.bf16.mxu1 %v1713_v63  ;;  %1602 = vmatprep.subr.bf16.mxu0 %v1714_v0  ;;  %vm1368_vm3 = vcmp.lt.s32.totalorder %v1365_v61, 8  ;;  %vm1382_vm4 = vcmp.eq.s32.totalorder %v1365_v61, 8 }
 0x34d   :  { %v677_v14 = vmax.f32 %v627_v3, 0.0  ;;  %v679_v15 = vmax.f32 %v668_v4, 0.0  ;;  %v684_v42 = vpack.c.bf16 %v676_v41, %v676_v41  ;;  %v686_v43 = vpack.c.bf16 %v678_v19, %v678_v19 }
 0x34e   :  { %v629_v16 = vpop.f32.mrf.mxu1  ;;  %v670_v17 = vpop.f32.mrf.mxu0 }
 0x34f   :  { %v685_v18 = vpack.c.bf16 %v677_v14, %v677_v14  ;;  %v687_v20 = vpack.c.bf16 %v679_v15, %v679_v15  ;;  %1581 = vmatpush3.bf16.msra.mxu1 %v1715_v5  ;;  %1603 = vmatpush3.bf16.msra.mxu0 %v1716_v6 }
 0x350   :  { %1582 = vmatprep.subr.bf16.mxu1 %v1717_v9  ;;  %1604 = vmatprep.subr.bf16.mxu0 %v1718_v12 }
 0x351   :  { %1316 = vmatprep.mubr.bf16.mxu1 %v685_v18  ;;  %1356 = vmatprep.mubr.bf16.mxu0 %v687_v20 }
 0x353   :  { %1583 = vmatpush3.bf16.msra.mxu1 %v1719_v21  ;;  %1605 = vmatpush3.bf16.msra.mxu0 %v1720_v22 }
 0x354   :  { %1584 = vmatprep.subr.bf16.mxu1 %v1721_v23  ;;  %1606 = vmatprep.subr.bf16.mxu0 %v1722_v24 }
 0x357   :  { %1585 = vmatpush3.bf16.msra.mxu1 %v1723_v27  ;;  %1607 = vmatpush3.bf16.msra.mxu0 %v1724_v28 }
 0x358   :  { %1586 = vmatprep.subr.bf16.mxu1 %v1725_v31  ;;  %1608 = vmatprep.subr.bf16.mxu0 %v1726_v32 }
 0x35b   :  { %1587 = vmatpush3.bf16.msra.mxu1 %v1727_v33  ;;  %1609 = vmatpush3.bf16.msra.mxu0 %v1728_v34 }
 0x35c   :  { %1588 = vmatprep.subr.bf16.mxu1 %v1729_v37  ;;  %1610 = vmatprep.subr.bf16.mxu0 %v1730_v38 }
 0x35f   :  { %1589 = vmatpush3.bf16.msra.mxu1 %v1731_v39  ;;  %1611 = vmatpush3.bf16.msra.mxu0 %v1732_v40 }
 0x362   :  { %1317 = vmatmul.mubr.bf16.vlgmr.msra.gmra.mxu1 %v684_v42  ;;  %1357 = vmatmul.mubr.bf16.vlgmr.msra.gmra.mxu0 %v686_v43 }
 0x402   :  { %v1546_v44 = vpop.f32.mrf.mxu1  ;;  %v1568_v45 = vpop.f32.mrf.mxu0 }
 0x404   :  { %v1547_v46 = vpop.f32.mrf.mxu1  ;;  %v1569_v47 = vpop.f32.mrf.mxu0 }
 0x405   :  { %v1548_v54 = vadd.f32 %v1547_v46, %v1546_v44  ;;  %v1570_v58 = vadd.f32 %v1569_v47, %v1568_v45 }
 0x406   :  { %v1549_v48 = vpop.f32.mrf.mxu1  ;;  %v1571_v49 = vpop.f32.mrf.mxu0 }
 0x407   :  { %v1239_v55 = vadd.f32 %v1548_v54, %v819_v53 }
 0x408   :  { %v1550_v50 = vpop.f32.mrf.mxu1  ;;  %v1572_v51 = vpop.f32.mrf.mxu0 }
 0x409   :  { %v1279_v62 = vadd.f32 %v1570_v58, %v1239_v55 }
 0x422   :  { %v1590_v56 = vpop.f32.mrf.mxu1  ;;  %v1612_v57 = vpop.f32.mrf.mxu0 }
 0x424   :  { %v1591_v59 = vpop.f32.mrf.mxu1  ;;  %v1613_v60 = vpop.f32.mrf.mxu0 }
 0x425   :  { %v1592_v63 = vadd.f32 %v1591_v59, %v1590_v56  ;;  %v1614_v3 = vadd.f32 %v1613_v60, %v1612_v57 }
 0x426   :  { %v1593_v0 = vpop.f32.mrf.mxu1  ;;  %v1615_v1 = vpop.f32.mrf.mxu0 }
 0x427   :  { %v1319_v2 = vadd.f32 %v1592_v63, %v1279_v62 }
 0x428   :  { %v1594_v4 = vpop.f32.mrf.mxu1  ;;  %v1616_v5 = vpop.f32.mrf.mxu0 }
 0x429   :  { %v1359_v11 = vadd.f32 %v1614_v3, %v1319_v2 }
 0x42b   :  { %v1371_v13 = vsel %vm1368_vm3, %v1359_v11, 0.0  ;;  %v1383_v6 = vsel %vm1382_vm4, %v1359_v11, 0.0 }
 0x42c   :  { %1372 = vadd.xlane.f32.xlu0 %v1371_v13 }
 0x430   :  { %1384 = vadd.xlane.f32.xlu0 %v1383_v6 }
 0x4b5   :  { %v1373_v7 = vpop.xlane.xlu0 %1372 }
 0x4b6   :  { %v1374_v8 = vrot.slane %v1373_v7, 4 }
 0x4b8   :  { %v1375_v9 = vadd.f32 %v1374_v8, %v1373_v7 }
 0x4b9   :  { %v1385_v16 = vpop.xlane.xlu0 %1384 }
 0x4ba   :  { %v1376_v12 = vrot.slane %v1375_v9, 2  ;;  %v1386_v17 = vadd.f32 %v1385_v16, %v1359_v11 }
 0x4bc   :  { %v1377_v10 = vadd.f32 %v1376_v12, %v1375_v9 }
 0x4be   :  { %v1378_v14 = vrot.slane %v1377_v10, 1 }
 0x4c0   :  { %v1379_v15 = vadd.f32 %v1378_v14, %v1377_v10 }
 0x4c2   :  { %1648 = vpush %v1379_v15 }
 0x4f3   :  { %s1649_s4 = spop %1648 }
 0x4f4   :  { %s1381_s12 = smul.f32 0.015625, %s1649_s4 }
 0x4f6   :  { %v1387_v18 = vstv %s1381_s12 }
 0x4f7   :  { %v1388_v20 = vsub.f32 %v1386_v17, %v1387_v18 }
 0x4f9   :  { %1389 = vst [vmem:[#allocation7] sm:$0xff] %v1388_v20 }
 0x4fa   :  { %1784 = shalt.err (!%p1781_p0)
}
 0x4fb   :  { %1399 = dma.vmem_to_hbm [thread:$0]  %s1397_s0, 128, %s1939_s5, [#allocation4]  }
 0x4fc   :  { %1797 = dma.done.wait [#allocation4], 128  }
 0x4fd   :  { %1798 = vsyncadd [#allocation4], 4294967168 }
 0x4fe   :  { %1403 = vsyncpa [#allocation3], 1 }
 0x4ff   :  { %1404 = vsyncpa [#allocation6], 1 }
 0x500   :  { %1405 = vsyncpa [#allocation4], 1 }

</bundles_post_ra>
